<compile_context>
chip_gen: v7x
topology: tpu7x:2x2x1
jax: 0.10.0
libtpu: 0.0.40
codegen_flags: <defaults>
</compile_context>

<pallas_src>
import jax
import jax.numpy as jnp
from jax.experimental import pallas as pl
from jax.experimental.pallas import tpu as pltpu


def rep_embedding_kernel(idx_ref, tab_l_ref, tab_r_ref, b_ref, o_ref):
    # idx_ref:   (tp, 2)  int32   paired token ids (even token, odd token)
    # tab_l_ref: (V, 2H)  bf16    fused emb@W.T in cols [0:H), zeros in [H:2H)
    # tab_r_ref: (V, 2H)  bf16    zeros in cols [0:H), fused emb@W.T in [H:2H)
    # b_ref:     (1, 2H)  f32     bias tiled twice
    # o_ref:     (tp, 2H) f32     lane-dense output tile
    idx = idx_ref[...]                                     # (tp, 2)
    tp = idx.shape[0]
    V = tab_l_ref.shape[0]

    # One-hot per token half (exact in bf16); gather+linear fused on the MXU.
    lane = jax.lax.broadcasted_iota(jnp.int32, (tp, V), 1)
    oh_even = (lane == idx[:, 0:1]).astype(tab_l_ref.dtype)   # (tp, V)
    oh_odd = (lane == idx[:, 1:2]).astype(tab_r_ref.dtype)    # (tp, V)

    h = jnp.dot(oh_even, tab_l_ref[...], preferred_element_type=jnp.float32)
    h = h + jnp.dot(oh_odd, tab_r_ref[...], preferred_element_type=jnp.float32)
    h = h + b_ref[...]                                      # f32 epilogue
    o_ref[...] = jnp.maximum(h, 0.0).astype(o_ref.dtype)


def prepare_rep_embedding_params(emb_table, W, b, param_dtype=jnp.bfloat16):
    """One-time parameter prep (hoist out of the inference hot path).

    Returns (tab_left, tab_right, bias2):
      tab_left[v]  = [emb_table[v] @ W.T , 0]    (V, 2H)
      tab_right[v] = [0 , emb_table[v] @ W.T]    (V, 2H)
      bias2        = [b , b]                      (1, 2H) f32
    """
    W = jnp.asarray(W, jnp.float32)                         # (H, E) PyTorch layout
    H = W.shape[0]
    fused = (jnp.asarray(emb_table, jnp.float32) @ W.T).astype(param_dtype)  # (V, H)
    zeros = jnp.zeros_like(fused)
    tab_l = jnp.concatenate([fused, zeros], axis=1)         # (V, 2H)
    tab_r = jnp.concatenate([zeros, fused], axis=1)         # (V, 2H)
    bias2 = jnp.tile(jnp.asarray(b, jnp.float32).reshape(1, H), (1, 2))  # (1, 2H)
    return tab_l, tab_r, bias2


def rep_embedding_forward(X, tab_l, tab_r, bias2, *, tokens_per_tile=512):
    """X: (B, S) integer token ids.  Returns (B, S, H) float32
    = relu(embedding(X) @ W.T + b), with params from prepare_rep_embedding_params."""
    B, S = X.shape
    N = B * S
    V, twoH = tab_l.shape
    H = twoH // 2

    # Two tokens per lane-dense output row.
    P = pl.cdiv(N, 2)                                       # pair-rows needed
    tp_cap = ((P + 7) // 8) * 8                             # whole problem, 8-aligned
    tp = min(max(tokens_per_tile // 2, 8), tp_cap)
    tp = max(8, (tp // 8) * 8)                              # sublane alignment
    P_pad = pl.cdiv(P, tp) * tp

    ids = jnp.asarray(X, jnp.int32).reshape(-1)
    ids = jnp.pad(ids, (0, 2 * P_pad - N))                  # pad with id 0; rows discarded
    idx2 = ids.reshape(P_pad, 2)

    out = pl.pallas_call(
        rep_embedding_kernel,
        out_shape=jax.ShapeDtypeStruct((P_pad, twoH), jnp.float32),
        grid_spec=pltpu.PrefetchScalarGridSpec(
            num_scalar_prefetch=0,
            grid=(P_pad // tp,),
            in_specs=[
                pl.BlockSpec((tp, 2), lambda i: (i, 0)),    # paired token ids
                pl.BlockSpec((V, twoH), lambda i: (0, 0)),  # fused table, left half
                pl.BlockSpec((V, twoH), lambda i: (0, 0)),  # fused table, right half
                pl.BlockSpec((1, twoH), lambda i: (0, 0)),  # bias (tiled x2)
            ],
            out_specs=pl.BlockSpec((tp, twoH), lambda i: (i, 0)),
        ),
        compiler_params=pltpu.CompilerParams(
            dimension_semantics=("parallel",)),
    )(idx2, tab_l, tab_r, bias2)

    # (P_pad, 2H) row-major bytes == (2*P_pad, H) row-major bytes.
    return out.reshape(2 * P_pad, H)[:N].reshape(B, S, H)


if __name__ == "__main__":
    # Small shapes consistent with the module.
    vocab_size, embed_dim, hidden_dim = 100, 32, 64
    batch, seq = 2, 8

    key = jax.random.PRNGKey(0)
    k_emb, k_w, k_b, k_x = jax.random.split(key, 4)

    # Deterministic synthetic parameters (not a checkpoint load).
    emb_table = jax.random.normal(k_emb, (vocab_size, embed_dim), jnp.float32)
    W = jax.random.normal(k_w, (hidden_dim, embed_dim), jnp.float32) * 0.1
    b = jax.random.normal(k_b, (hidden_dim,), jnp.float32) * 0.1
    X = jax.random.randint(k_x, (batch, seq), 0, vocab_size, jnp.int32)

    # Pure-JAX reference.
    ref = jnp.maximum(jnp.take(emb_table, X, axis=0) @ W.T + b, 0.0)

    # Exact-math check with f32 params.
    params_f32 = prepare_rep_embedding_params(emb_table, W, b, param_dtype=jnp.float32)
    out_f32 = jax.block_until_ready(rep_embedding_forward(X, *params_f32))
    assert out_f32.shape == (batch, seq, hidden_dim)
    assert jnp.allclose(out_f32, ref, atol=1e-4, rtol=1e-4)

    # Default bf16-table fast path (f32 accumulation), looser tolerance.
    params = prepare_rep_embedding_params(emb_table, W, b)
    out = jax.block_until_ready(rep_embedding_forward(X, *params))
    assert out.shape == (batch, seq, hidden_dim)
    assert jnp.allclose(out, ref, atol=5e-2, rtol=5e-2)

    print("KERNEL_OK")
</pallas_src>

<mosaic_0001>
module attributes {stable_mosaic.version = 11 : i64} {
  func.func @rep_embedding_kernel(%arg0: i32, %arg1: memref<8x2xi32, #tpu.memory_space<vmem>>, %arg2: memref<100x128xf32, #tpu.memory_space<vmem>>, %arg3: memref<100x128xf32, #tpu.memory_space<vmem>>, %arg4: memref<1x128xf32, #tpu.memory_space<vmem>>, %arg5: memref<8x128xf32, #tpu.memory_space<vmem>>) attributes {dimension_semantics = [#tpu.dimension_semantics<parallel>], iteration_bounds = array<i64: 1>, scalar_prefetch = 0 : i64, scratch_operands = 0 : i64, tpu.core_type = #tpu.core_type<tc>, window_params = [{transform_indices = @transform_0, window_bounds = array<i64: 8, 2>}, {pipeline_mode = #tpu.pipeline_mode<synchronous>, transform_indices = @transform_1, window_bounds = array<i64: 100, 128>}, {pipeline_mode = #tpu.pipeline_mode<synchronous>, transform_indices = @transform_2, window_bounds = array<i64: 100, 128>}, {pipeline_mode = #tpu.pipeline_mode<synchronous>, transform_indices = @transform_3, window_bounds = array<i64: 1, 128>}, {transform_indices = @transform_4, window_bounds = array<i64: 8, 128>}]} {
    %c0 = arith.constant 0 : index
    %c0_0 = arith.constant 0 : index
    %0 = vector.load %arg1[%c0, %c0_0] : memref<8x2xi32, #tpu.memory_space<vmem>>, vector<8x2xi32>
    %1 = tpu.iota {dimensions = array<i32: 1>} : vector<8x100xi32>
    %2 = vector.extract_strided_slice %0 {offsets = [0, 0], sizes = [8, 1], strides = [1, 1]} : vector<8x2xi32> to vector<8x1xi32>
    %3 = vector.broadcast %2 : vector<8x1xi32> to vector<8x100xi32>
    %4 = arith.cmpi eq, %1, %3 : vector<8x100xi32>
    %5 = arith.extui %4 : vector<8x100xi1> to vector<8x100xi32>
    %6 = arith.sitofp %5 : vector<8x100xi32> to vector<8x100xf32>
    %7 = vector.extract_strided_slice %0 {offsets = [0, 1], sizes = [8, 1], strides = [1, 1]} : vector<8x2xi32> to vector<8x1xi32>
    %8 = vector.broadcast %7 : vector<8x1xi32> to vector<8x100xi32>
    %9 = arith.cmpi eq, %1, %8 : vector<8x100xi32>
    %10 = arith.extui %9 : vector<8x100xi1> to vector<8x100xi32>
    %11 = arith.sitofp %10 : vector<8x100xi32> to vector<8x100xf32>
    %c0_1 = arith.constant 0 : index
    %c0_2 = arith.constant 0 : index
    %12 = vector.load %arg2[%c0_1, %c0_2] : memref<100x128xf32, #tpu.memory_space<vmem>>, vector<100x128xf32>
    %cst = arith.constant dense<0.000000e+00> : vector<8x128xf32>
    %13 = tpu.matmul %6, %12, %cst {dimension_numbers = #tpu.dot_dimension_numbers<[1], [0], [0], [1], [0, 0, 1, 1], [], []>} : vector<8x100xf32>, vector<100x128xf32>, vector<8x128xf32> -> vector<8x128xf32>
    %c0_3 = arith.constant 0 : index
    %c0_4 = arith.constant 0 : index
    %14 = vector.load %arg3[%c0_3, %c0_4] : memref<100x128xf32, #tpu.memory_space<vmem>>, vector<100x128xf32>
    %cst_5 = arith.constant dense<0.000000e+00> : vector<8x128xf32>
    %15 = tpu.matmul %11, %14, %cst_5 {dimension_numbers = #tpu.dot_dimension_numbers<[1], [0], [0], [1], [0, 0, 1, 1], [], []>} : vector<8x100xf32>, vector<100x128xf32>, vector<8x128xf32> -> vector<8x128xf32>
    %16 = arith.addf %13, %15 : vector<8x128xf32>
    %c0_6 = arith.constant 0 : index
    %c0_7 = arith.constant 0 : index
    %17 = vector.load %arg4[%c0_6, %c0_7] : memref<1x128xf32, #tpu.memory_space<vmem>>, vector<1x128xf32>
    %18 = vector.broadcast %17 : vector<1x128xf32> to vector<8x128xf32>
    %19 = arith.addf %16, %18 : vector<8x128xf32>
    %cst_8 = arith.constant 0.000000e+00 : f32
    %20 = vector.broadcast %cst_8 : f32 to vector<8x128xf32>
    %21 = arith.maximumf %19, %20 : vector<8x128xf32>
    %c0_9 = arith.constant 0 : index
    %c0_10 = arith.constant 0 : index
    %22 = vector.load %arg5[%c0_9, %c0_10] : memref<8x128xf32, #tpu.memory_space<vmem>>, vector<8x128xf32>
    tpu.vector_store %arg5[%c0_9, %c0_10], %21 {strides = array<i32>} : memref<8x128xf32, #tpu.memory_space<vmem>>, vector<8x128xf32>,
    return
  }
  func.func @transform_0(%arg0: i32) -> (i32, i32) {
    %c0_i32 = arith.constant 0 : i32
    %c0_i32_0 = arith.constant 0 : i32
    return %arg0, %c0_i32 : i32, i32
  }
  func.func @transform_1(%arg0: i32) -> (i32, i32) {
    %c0_i32 = arith.constant 0 : i32
    %c0_i32_0 = arith.constant 0 : i32
    %c0_i32_1 = arith.constant 0 : i32
    return %c0_i32, %c0_i32_0 : i32, i32
  }
  func.func @transform_2(%arg0: i32) -> (i32, i32) {
    %c0_i32 = arith.constant 0 : i32
    %c0_i32_0 = arith.constant 0 : i32
    %c0_i32_1 = arith.constant 0 : i32
    return %c0_i32, %c0_i32_0 : i32, i32
  }
  func.func @transform_3(%arg0: i32) -> (i32, i32) {
    %c0_i32 = arith.constant 0 : i32
    %c0_i32_0 = arith.constant 0 : i32
    %c0_i32_1 = arith.constant 0 : i32
    return %c0_i32, %c0_i32_0 : i32, i32
  }
  func.func @transform_4(%arg0: i32) -> (i32, i32) {
    %c0_i32 = arith.constant 0 : i32
    %c0_i32_0 = arith.constant 0 : i32
    return %arg0, %c0_i32 : i32, i32
  }
}

</mosaic_0001>

<bundles_post_ra>
// kernel: tpu_custom_call.1
= control target key start
LH: loop header
LB: loop body
LE: loop exit
PB: predicated region body
PF: predicated region fallthrough
CT: control target
= control target key end

     0   :  { %9 = vsyncpa [#allocation3], 0  ;;  %s575_s0 = inlined_call_operand.vmem [shape: s32[8,2], index: 0, kind: input, shape index: {}]   ;;  %s576_s1 = inlined_call_operand.hbm [shape: f32[100,128], index: 1, kind: input, shape index: {}]   ;;  %s577_s2 = inlined_call_operand.hbm [shape: f32[100,128], index: 2, kind: input, shape index: {}]   ;;  %s578_s3 = inlined_call_operand.vmem [shape: f32[1,128], index: 3, kind: input, shape index: {}]   ;;  %s579_s4 = inlined_call_operand.hbm [shape: f32[8,128], index: 4, kind: output, shape index: {}]  }
   0x1   :  { %10 = vsyncpa [#allocation6], 0 }
   0x2   :  { %11 = vsyncpa [#allocation4], 0  ;;  %s480_s15 = smov [#allocation2]   ;;  %s408_s19 = scalar_lea.hbm %s576_s1, 1664 }
   0x3   :  { %s19_s16 = sshll.u32 %s480_s15, 4  ;;  %p409_p0 = scmp.ne.s32.totalorder %s576_s1, %s408_s19  ;;  %s20_s16 = int_to_ptr.vmem [resolvable:$true] %s19_s16 }
   0x4   :  { %p412_p1 = scmp.lt.u32.totalorder %s408_s19, %s576_s1 }
   0x6   :  { %p414_p2 = pnand %p412_p1, %p409_p0 }
   0x8   :  { %417 = shalt.err (!%p414_p2)
}
   0x9   :  { %s418_s24 = scalar_lea.vmem %s20_s16, 1664  ;;  %p423_p4 = scmp.lt.s32.totalorder %s20_s16, %s20_s16 }
   0xa   :  { %p419_p3 = scmp.ne.s32.totalorder %s20_s16, %s418_s24  ;;  %p424_p5 = scmp.lt.s32.totalorder %s418_s24, %s418_s24 }
   0xc   :  { %p425_p6 = por %p424_p5, %p423_p4 }
   0xe   :  { %p426_p7 = pnand %p425_p6, %p419_p3 }
  0x10   :  { %429 = shalt.err (!%p426_p7)
}
  0x11   :  { %s481_s25 = smov 128   ;;  %s482_s26 = smov 8  }
  0x12   :  { %25 = dma.hbm_to_vmem [thread:$0]  %s576_s1, 1664, %s20_s16, [#allocation3], %s481_s25, %s481_s25, %s482_s26  }
  0x13   :  { %s483_s29 = smov [#allocation5]   ;;  %s430_s7 = scalar_lea.hbm %s577_s2, 1664 }
  0x14   :  { %s31_s30 = sshll.u32 %s483_s29, 4  ;;  %p431_p8 = scmp.ne.s32.totalorder %s577_s2, %s430_s7  ;;  %s32_s30 = int_to_ptr.vmem [resolvable:$true] %s31_s30 }
  0x15   :  { %p434_p9 = scmp.lt.u32.totalorder %s430_s7, %s577_s2 }
  0x17   :  { %p436_p10 = pnand %p434_p9, %p431_p8 }
  0x19   :  { %439 = shalt.err (!%p436_p10)
}
  0x1a   :  { %s440_s12 = scalar_lea.vmem %s32_s30, 1664  ;;  %p445_p12 = scmp.lt.s32.totalorder %s32_s30, %s32_s30 }
  0x1b   :  { %p441_p11 = scmp.ne.s32.totalorder %s32_s30, %s440_s12  ;;  %p446_p13 = scmp.lt.s32.totalorder %s440_s12, %s440_s12 }
  0x1d   :  { %p447_p0 = por %p446_p13, %p445_p12 }
  0x1f   :  { %p448_p1 = pnand %p447_p0, %p441_p11 }
  0x21   :  { %451 = shalt.err (!%p448_p1)
}
  0x22   :  { %37 = dma.hbm_to_vmem [thread:$0]  %s577_s2, 1664, %s32_s30, [#allocation6], %s481_s25, %s481_s25, %s482_s26  }
  0x23   :  { %474 = dma.done.wait [#allocation3], 1664  }
  0x24   :  { %475 = vsyncadd [#allocation3], 4294965632 }
  0x25   :  { %476 = dma.done.wait [#allocation6], 1664  }
  0x26   :  { %477 = vsyncadd [#allocation6], 4294965632  ;;  %v484_v0 = vmov 0   ;;  %v485_v1 = vmov 0.0|0.0   ;;  %v46_v2 = vld [vmem:[%s575_s0] sm:$0xff]  ;;  %v61_v3 = vld [vmem:[#allocation2] sm:$0xff]  ;;  %v47_v43 = vlaneseq }
  0x27   :  { %406 = vset.pattern.permute.xlu0 %v484_v0  ;;  %378 = vmatprep.subr.bf16.mxu1 %v485_v1  ;;  %v62_v4 = vld [vmem:[#allocation2 + $0x8] sm:$0xff]  ;;  %v63_v6 = vld [vmem:[#allocation2 + $0x10] sm:$0xff]  ;;  %v64_v7 = vld [vmem:[#allocation2 + $0x18] sm:$0xff]  ;;  %vm486_vm0 = vmmov 0   ;;  %v487_v10 = vmov 0.0   ;;  %v488_v17 = vmov 1  }
  0x28   :  { %360 = vmatprep.subr.bf16.mxu0 %v485_v1  ;;  %50 = vperm.xlu0 %406, %v46_v2   ;;  %v379_v5 = vpack.c.bf16 %v62_v4, %v61_v3  ;;  %v74_v8 = vld [vmem:[#allocation5] sm:$0xff]  ;;  %v75_v9 = vld [vmem:[#allocation5 + $0x8] sm:$0xff]  ;;  %v382_v11 = vpack.c.bf16 %v64_v7, %v63_v6  ;;  %v76_v13 = vld [vmem:[#allocation5 + $0x10] sm:$0xff]  ;;  %vm91_vm1 = vcmask 1043456   ;;  %v48_v44 = vand.u32 127, %v47_v43  ;;  %s489_s16 = smov [#allocation7]  }
  0x29   :  { %357 = vmatprep.mubr.msk.f32.mxu1 %vm486_vm0, %v487_v10  ;;  %328 = vmatprep.mubr.msk.f32.mxu0 %vm486_vm0, %v487_v10  ;;  %v361_v12 = vpack.c.bf16 %v75_v9, %v74_v8  ;;  %v77_v14 = vld [vmem:[#allocation5 + $0x18] sm:$0xff]  ;;  %v66_v16 = vld [vmem:[#allocation2 + $0x28] sm:$0xff]  ;;  %v79_v20 = vld [vmem:[#allocation5 + $0x28] sm:$0xff]  ;;  %vm87_vm2 = vcmask 818176   ;;  %s257_s17 = sshll.u32 %s489_s16, 4  ;;  %s258_s17 = int_to_ptr.vmem [resolvable:$true] %s257_s17 }
  0x2a   :  { %380 = vmatpush3.bf16.msra.mxu1 %v379_v5  ;;  %v65_v15 = vld [vmem:[#allocation2 + $0x20] sm:$0xff]  ;;  %v364_v18 = vpack.c.bf16 %v77_v14, %v76_v13  ;;  %v78_v19 = vld [vmem:[#allocation5 + $0x20] sm:$0xff]  ;;  %v67_v22 = vld [vmem:[#allocation2 + $0x30] sm:$0xff]  ;;  %s452_s18 = scalar_lea.vmem %s258_s17, 128  ;;  %p457_p3 = scmp.lt.s32.totalorder %s258_s17, %s258_s17 }
  0x2b   :  { %381 = vmatprep.subr.bf16.mxu1 %v485_v1  ;;  %362 = vmatpush3.bf16.msra.mxu0 %v361_v12  ;;  %v385_v21 = vpack.c.bf16 %v66_v16, %v65_v15  ;;  %v68_v23 = vld [vmem:[#allocation2 + $0x38] sm:$0xff]  ;;  %v367_v24 = vpack.c.bf16 %v79_v20, %v78_v19  ;;  %v81_v26 = vld [vmem:[#allocation5 + $0x38] sm:$0xff]  ;;  %v70_v29 = vld [vmem:[#allocation2 + $0x48] sm:$0xff]  ;;  %p453_p2 = scmp.ne.s32.totalorder %s258_s17, %s452_s18  ;;  %p458_p4 = scmp.lt.s32.totalorder %s452_s18, %s452_s18 }
  0x2c   :  { %407 = vset.pattern.permute.xlu0 %v488_v17  ;;  %363 = vmatprep.subr.bf16.mxu0 %v485_v1  ;;  %v80_v25 = vld [vmem:[#allocation5 + $0x30] sm:$0xff]  ;;  %v388_v27 = vpack.c.bf16 %v68_v23, %v67_v22  ;;  %v69_v28 = vld [vmem:[#allocation2 + $0x40] sm:$0xff]  ;;  %v82_v31 = vld [vmem:[#allocation5 + $0x40] sm:$0xff] }
  0x2d   :  { %56 = vperm.xlu0 %407, %v46_v2   ;;  %v370_v30 = vpack.c.bf16 %v81_v26, %v80_v25  ;;  %v83_v32 = vld [vmem:[#allocation5 + $0x48] sm:$0xff]  ;;  %v391_v33 = vpack.c.bf16 %v70_v29, %v69_v28  ;;  %v72_v35 = vld [vmem:[#allocation2 + $0x58] sm:$0xff]  ;;  %v85_v38 = vld [vmem:[#allocation5 + $0x58] sm:$0xff]  ;;  %p459_p5 = por %p458_p4, %p457_p3 }
  0x2e   :  { %383 = vmatpush3.bf16.msra.mxu1 %v382_v11  ;;  %v71_v34 = vld [vmem:[#allocation2 + $0x50] sm:$0xff]  ;;  %v373_v36 = vpack.c.bf16 %v83_v32, %v82_v31  ;;  %v84_v37 = vld [vmem:[#allocation5 + $0x50] sm:$0xff]  ;;  %v73_v41 = vld [vmem:[#allocation2 + $0x60] sm:$0xf] }
  0x2f   :  { %384 = vmatprep.subr.bf16.mxu1 %v485_v1  ;;  %365 = vmatpush3.bf16.msra.mxu0 %v364_v18  ;;  %v394_v39 = vpack.c.bf16 %v72_v35, %v71_v34  ;;  %v376_v40 = vpack.c.bf16 %v85_v38, %v84_v37  ;;  %v86_v42 = vld [vmem:[#allocation5 + $0x60] sm:$0xf]  ;;  %v273_v52 = vld [vmem:[%s578_s3] ss:$0 sm:$0xff]  ;;  %p460_p6 = pnand %p459_p5, %p453_p2 }
  0x30   :  { %366 = vmatprep.subr.bf16.mxu0 %v485_v1 }
  0x32   :  { %386 = vmatpush3.bf16.msra.mxu1 %v385_v21 }
  0x33   :  { %387 = vmatprep.subr.bf16.mxu1 %v485_v1  ;;  %368 = vmatpush3.bf16.msra.mxu0 %v367_v24 }
  0x34   :  { %369 = vmatprep.subr.bf16.mxu0 %v485_v1 }
  0x36   :  { %389 = vmatpush3.bf16.msra.mxu1 %v388_v27 }
  0x37   :  { %390 = vmatprep.subr.bf16.mxu1 %v485_v1  ;;  %371 = vmatpush3.bf16.msra.mxu0 %v370_v30 }
  0x38   :  { %372 = vmatprep.subr.bf16.mxu0 %v485_v1 }
  0x3a   :  { %392 = vmatpush3.bf16.msra.mxu1 %v391_v33 }
  0x3b   :  { %393 = vmatprep.subr.bf16.mxu1 %v485_v1  ;;  %374 = vmatpush3.bf16.msra.mxu0 %v373_v36 }
  0x3c   :  { %375 = vmatprep.subr.bf16.mxu0 %v485_v1 }
  0x3e   :  { %395 = vmatpush3.bf16.msra.mxu1 %v394_v39 }
  0x3f   :  { %355 = vmatprep.subr.mxu1 %v487_v10  ;;  %377 = vmatpush3.bf16.msra.mxu0 %v376_v40 }
  0x40   :  { %326 = vmatprep.subr.mxu0 %v487_v10 }
  0x42   :  { %356 = vmatpush3.msk.msra.mxu1 %vm91_vm1, %v73_v41 }
  0x43   :  { %327 = vmatpush3.msk.msra.mxu0 %vm91_vm1, %v86_v42 }
  0xa7   :  { %v51_v45 = vpop.permute.xlu0 %50 }
  0xa8   :  { %vm52_vm3 = vcmp.eq.s32.totalorder %v48_v44, %v51_v45 }
  0xa9   :  { %v267_v46 = vsel %vm52_vm3, 1.0, %v487_v10 }
  0xaa   :  { %358 = vmatmul.mubr.msk.f32.vlgmr.msra.gmra.mrb[0].mxu1 %vm87_vm2, %v267_v46 }
  0xac   :  { %v57_v47 = vpop.permute.xlu0 %56 }
  0xad   :  { %vm58_vm4 = vcmp.eq.s32.totalorder %v48_v44, %v57_v47 }
  0xae   :  { %v268_v48 = vsel %vm58_vm4, 1.0, %v487_v10 }
  0xaf   :  { %329 = vmatmul.mubr.msk.f32.vlgmr.msra.gmra.mrb[0].mxu0 %vm87_vm2, %v268_v48 }
 0x17d   :  { %v237_v49 = vpop.f32.mrb[0].mxu1 }
 0x17e   :  { %v359_v50 = vpop.f32.mrb[1].mxu1 }
 0x182   :  { %v161_v51 = vpop.f32.mrb[0].mxu0 }
 0x183   :  { %v238_v53 = vadd.f32 %v237_v49, %v161_v51  ;;  %v330_v54 = vpop.f32.mrb[1].mxu0 }
 0x185   :  { %v248_v55 = vadd.f32 %v273_v52, %v238_v53 }
 0x187   :  { %v249_v56 = vmax.f32 %v248_v55, 0.0 }
 0x189   :  { %250 = vst [vmem:[#allocation7] sm:$0xff] %v249_v56 }
 0x18a   :  { %463 = shalt.err (!%p460_p6)
}
 0x18b   :  { %s464_s21 = scalar_lea.hbm %s579_s4, 128 }
 0x18c   :  { %p465_p7 = scmp.ne.s32.totalorder %s579_s4, %s464_s21  ;;  %p468_p8 = scmp.lt.u32.totalorder %s464_s21, %s579_s4 }
 0x18e   :  { %p470_p9 = pnand %p468_p8, %p465_p7 }
 0x190   :  { %473 = shalt.err (!%p470_p9)
}
 0x191   :  { %260 = dma.vmem_to_hbm [thread:$0]  %s258_s17, 128, %s579_s4, [#allocation4]  }
 0x192   :  { %478 = dma.done.wait [#allocation4], 128  }
 0x193   :  { %479 = vsyncadd [#allocation4], 4294967168 }
 0x194   :  { %264 = vsyncpa [#allocation3], 1 }
 0x195   :  { %265 = vsyncpa [#allocation6], 1 }
 0x196   :  { %266 = vsyncpa [#allocation4], 1 }

</bundles_post_ra>
